<compile_context>
chip_gen: v6e
topology: v6e:2x2x1
jax: 0.10.0
libtpu: 0.0.40
codegen_flags: <defaults>
</compile_context>

<pallas_src>
import jax
import jax.numpy as jnp
from jax.experimental import pallas as pl
from jax.experimental.pallas import tpu as pltpu

F1_IN = 29    # conv1 input features
F1_PAD = 64   # conv1 input features zero-padded to half a 128-lane vreg
F_HID = 64    # conv1 output / conv2 input features
F2_OUT = 8    # conv2 output features
F2_PAD = 128  # conv2 output zero-padded to a full lane tile (lane-dense store)


def _net_fused_kernel(src_ref, dst_ref, w_ref, x_ref,
                      wrel1_ref, wroot1_ref, b1_ref,
                      wrel2_ref, wroot2_ref, b2_ref, o_ref):
    e = src_ref.shape[1]
    n = x_ref.shape[0]
    f32 = jnp.float32
    cdt = x_ref.dtype  # compute dtype (bf16 by default, f32 accumulation below)

    # ---- weighted adjacency, built ONCE and reused by both layers ----
    # Lane-dense [N, E] masks: E on the 128-lane axis, node ids on sublanes.
    node_ids = jax.lax.broadcasted_iota(jnp.int32, (n, e), 0)            # [N, E]
    # scatter_w[i, k] = w[k] iff dst[k] == i     (f32 for accurate edge sums)
    scatter_w = jnp.where(dst_ref[...] == node_ids, w_ref[...],
                          jnp.zeros((), dtype=w_ref.dtype))              # [N, E]
    # gather_t[j, k] = 1 iff src[k] == j
    gather_t = (src_ref[...] == node_ids).astype(w_ref.dtype)            # [N, E]
    # A = scatter_w @ gather_t^T  (contract on the E axis; f32 accumulation).
    # Edge indices >= N silently drop (no iota match) — matches the
    # reference's jit scatter-drop semantics; intended behavior.
    adj = jax.lax.dot_general(scatter_w, gather_t,
                              dimension_numbers=(((1,), (1,)), ((), ())),
                              preferred_element_type=f32)                # [N, N]
    adj_c = adj.astype(cdt)

    x = x_ref[...]                                                       # [N, 64]

    # ---- layer 1: GraphConv(29 -> 64) + ReLU ----
    agg1 = jnp.dot(adj_c, x, preferred_element_type=f32)                 # [N, 64]
    h = (jnp.dot(agg1.astype(cdt), wrel1_ref[...], preferred_element_type=f32)
         + jnp.dot(x, wroot1_ref[...], preferred_element_type=f32)
         + b1_ref[...])
    h = jnp.maximum(h, 0.0)                                              # f32 epilogue

    # F.dropout(x, training=self.training): no-op in eval mode.
    # TODO(synk): add PRNG-masked dropout (pltpu.prng_*) if training parity
    # is ever required.
    h_c = h.astype(cdt)

    # ---- layer 2: GraphConv(64 -> 8) + ReLU (out padded to 128 lanes) ----
    agg2 = jnp.dot(adj_c, h_c, preferred_element_type=f32)               # [N, 64]
    out = (jnp.dot(agg2.astype(cdt), wrel2_ref[...], preferred_element_type=f32)
           + jnp.dot(h_c, wroot2_ref[...], preferred_element_type=f32)
           + b2_ref[...])
    o_ref[...] = jnp.maximum(out, 0.0).astype(o_ref.dtype)               # [N, 128]


def prepare_params(params, compute_dtype=jnp.bfloat16):
    """Pay all layout work (transpose / pad / cast of weights) once, at init.

    compute_dtype=jnp.bfloat16 (default) targets the bf16-native MXU on
    v5e/v6e/v7x; accumulation stays f32 inside the kernel either way.
    Pass jnp.float32 for bit-tighter numerics.
    """
    def pad_rows(w_t, rows):
        return jnp.pad(w_t, ((0, rows - w_t.shape[0]), (0, 0)))

    def pad_cols(w_t, cols):
        return jnp.pad(w_t, ((0, 0), (0, cols - w_t.shape[1])))

    # conv1: W^T padded 29 -> 64 rows (x is zero-padded to 64 features too).
    wrel1 = pad_rows(jnp.transpose(params["conv1"]["w_rel"]), F1_PAD)    # [64, 64]
    wroot1 = pad_rows(jnp.transpose(params["conv1"]["w_root"]), F1_PAD)  # [64, 64]
    b1 = params["conv1"]["b_rel"].reshape(1, F_HID).astype(jnp.float32)

    # conv2: W^T with out-dim padded 8 -> 128 (lane-dense output store).
    wrel2 = pad_cols(jnp.transpose(params["conv2"]["w_rel"]), F2_PAD)    # [64, 128]
    wroot2 = pad_cols(jnp.transpose(params["conv2"]["w_root"]), F2_PAD)  # [64, 128]
    b2 = jnp.pad(params["conv2"]["b_rel"],
                 (0, F2_PAD - F2_OUT)).reshape(1, F2_PAD).astype(jnp.float32)

    return {
        "wrel1": wrel1.astype(compute_dtype),
        "wroot1": wroot1.astype(compute_dtype),
        "b1": b1,
        "wrel2": wrel2.astype(compute_dtype),
        "wroot2": wroot2.astype(compute_dtype),
        "b2": b2,
    }


def net_forward(x, edge_index, edge_weight, prepared):
    """Forward pass of `Net` (inference mode) as a single fused Pallas kernel."""
    n, f_in = x.shape
    e = edge_index.shape[1]
    cdt = prepared["wrel1"].dtype
    csz = jnp.dtype(cdt).itemsize

    x_pad = jnp.pad(x, ((0, 0), (0, F1_PAD - f_in))).astype(cdt)         # [N, 64]
    src = edge_index[0].astype(jnp.int32).reshape(1, e)                  # lane-dense
    dst = edge_index[1].astype(jnp.int32).reshape(1, e)
    w = edge_weight.astype(jnp.float32).reshape(1, e)                    # f32 weights

    flops = 2 * (n * e * n                 # adjacency build
                 + 2 * n * n * F_HID       # two aggregation dots
                 + 2 * n * F1_PAD * F_HID  # layer-1 rel/root dots
                 + 2 * n * F_HID * F2_PAD) # layer-2 rel/root dots (padded)
    bytes_accessed = (3 * e * 4                                    # src/dst/w
                      + n * F1_PAD * csz                           # x_pad
                      + (2 * F1_PAD * F_HID + 2 * F_HID * F2_PAD) * csz
                      + (F_HID + F2_PAD) * 4                       # biases
                      + n * F2_PAD * 4)                            # output

    out_pad = pl.pallas_call(
        _net_fused_kernel,
        out_shape=jax.ShapeDtypeStruct((n, F2_PAD), jnp.float32),
        in_specs=[
            pl.BlockSpec((1, e), lambda: (0, 0)),              # src ids (lane-dense)
            pl.BlockSpec((1, e), lambda: (0, 0)),              # dst ids
            pl.BlockSpec((1, e), lambda: (0, 0)),              # edge weights (f32)
            pl.BlockSpec((n, F1_PAD), lambda: (0, 0)),         # node features
            pl.BlockSpec((F1_PAD, F_HID), lambda: (0, 0)),     # W_rel1^T (padded)
            pl.BlockSpec((F1_PAD, F_HID), lambda: (0, 0)),     # W_root1^T (padded)
            pl.BlockSpec((1, F_HID), lambda: (0, 0)),          # b1
            pl.BlockSpec((F_HID, F2_PAD), lambda: (0, 0)),     # W_rel2^T (padded)
            pl.BlockSpec((F_HID, F2_PAD), lambda: (0, 0)),     # W_root2^T (padded)
            pl.BlockSpec((1, F2_PAD), lambda: (0, 0)),         # b2 (padded)
        ],
        out_specs=pl.BlockSpec((n, F2_PAD), lambda: (0, 0)),
        # Working set is now bounded by the N x N adjacency + [N,E] masks,
        # far below the default scoped-VMEM limit at these sizes (incl. v7x).
        compiler_params=pltpu.CompilerParams(),
        cost_estimate=pl.CostEstimate(flops=flops, transcendentals=0,
                                      bytes_accessed=bytes_accessed),
    )(src, dst, w, x_pad,
      prepared["wrel1"], prepared["wroot1"], prepared["b1"],
      prepared["wrel2"], prepared["wroot2"], prepared["b2"])
    return out_pad[:, :F2_OUT]


def net_reference(x, edge_index, edge_weight, params):
    """Plain-JAX reference (dense adjacency, highest-precision matmuls)."""
    hp = jax.lax.Precision.HIGHEST
    n = x.shape[0]
    src, dst = edge_index[0], edge_index[1]
    a = jnp.zeros((n, n), jnp.float32).at[dst, src].add(edge_weight)

    def layer(a, x, p):
        agg = jnp.dot(a, x, precision=hp)
        out = jnp.dot(agg, p["w_rel"].T, precision=hp) + p["b_rel"]
        out = out + jnp.dot(x, p["w_root"].T, precision=hp)
        return jax.nn.relu(out)

    h = layer(a, x, params["conv1"])
    return layer(a, h, params["conv2"])


def init_params(key):
    """Deterministic Glorot-ish init matching GraphConv parameter shapes."""
    k = jax.random.split(key, 6)

    def glorot(rng, fan_out, fan_in):
        scale = jnp.sqrt(6.0 / (fan_in + fan_out))
        return jax.random.uniform(rng, (fan_out, fan_in), jnp.float32,
                                  -scale, scale)

    return {
        "conv1": {
            "w_rel": glorot(k[0], F_HID, F1_IN),
            "b_rel": jax.random.uniform(k[1], (F_HID,), jnp.float32, -0.1, 0.1),
            "w_root": glorot(k[2], F_HID, F1_IN),
        },
        "conv2": {
            "w_rel": glorot(k[3], F2_OUT, F_HID),
            "b_rel": jax.random.uniform(k[4], (F2_OUT,), jnp.float32, -0.1, 0.1),
            "w_root": glorot(k[5], F2_OUT, F_HID),
        },
    }


if __name__ == "__main__":
    key = jax.random.PRNGKey(0)
    k_param, k_x, k_src, k_dst, k_w = jax.random.split(key, 5)

    num_nodes = 16
    num_edges = 48
    in_feats = F1_IN  # fixed by conv1 = GraphConv(29, 64)

    params = init_params(k_param)

    x = jax.random.normal(k_x, (num_nodes, in_feats), dtype=jnp.float32)
    edge_index = jnp.stack([
        jax.random.randint(k_src, (num_edges,), 0, num_nodes),
        jax.random.randint(k_dst, (num_edges,), 0, num_nodes),
    ], axis=0)
    edge_weight = jax.random.uniform(k_w, (num_edges,), jnp.float32, 0.1, 1.0)

    fwd = jax.jit(net_forward)
    ref = net_reference(x, edge_index, edge_weight, params)

    # f32 compute path: tight check against the HIGHEST-precision reference.
    prep_f32 = prepare_params(params, compute_dtype=jnp.float32)
    out_f32 = jax.block_until_ready(fwd(x, edge_index, edge_weight, prep_f32))
    assert out_f32.shape == (num_nodes, F2_OUT)
    assert bool(jnp.all(out_f32 >= 0.0))  # ReLU output
    assert bool(jnp.allclose(out_f32, ref, rtol=1e-2, atol=1e-2))

    # bf16 compute path (default, recommended on TPU): looser bf16 tolerance.
    prep_bf16 = prepare_params(params)
    out_bf16 = jax.block_until_ready(fwd(x, edge_index, edge_weight, prep_bf16))
    assert out_bf16.shape == (num_nodes, F2_OUT)
    assert bool(jnp.all(out_bf16 >= 0.0))
    assert bool(jnp.allclose(out_bf16, ref, rtol=5e-2, atol=5e-2))

    print("KERNEL_OK")
</pallas_src>

<mosaic_0001>
module attributes {stable_mosaic.version = 11 : i64} {
  func.func @_net_fused_kernel(%arg0: memref<1x48xi32, #tpu.memory_space<vmem>>, %arg1: memref<1x48xi32, #tpu.memory_space<vmem>>, %arg2: memref<1x48xf32, #tpu.memory_space<vmem>>, %arg3: memref<16x64xf32, #tpu.memory_space<vmem>>, %arg4: memref<64x64xf32, #tpu.memory_space<vmem>>, %arg5: memref<64x64xf32, #tpu.memory_space<vmem>>, %arg6: memref<1x64xf32, #tpu.memory_space<vmem>>, %arg7: memref<64x128xf32, #tpu.memory_space<vmem>>, %arg8: memref<64x128xf32, #tpu.memory_space<vmem>>, %arg9: memref<1x128xf32, #tpu.memory_space<vmem>>, %arg10: memref<16x128xf32, #tpu.memory_space<vmem>>) attributes {dimension_semantics = [], scalar_prefetch = 0 : i64, scratch_operands = 0 : i64, tpu.core_type = #tpu.core_type<tc>} {
    %0 = tpu.iota {dimensions = array<i32: 0>} : vector<16x48xi32>
    %c0 = arith.constant 0 : index
    %c0_0 = arith.constant 0 : index
    %1 = vector.load %arg1[%c0, %c0_0] : memref<1x48xi32, #tpu.memory_space<vmem>>, vector<1x48xi32>
    %2 = vector.broadcast %1 : vector<1x48xi32> to vector<16x48xi32>
    %3 = arith.cmpi eq, %2, %0 : vector<16x48xi32>
    %c0_1 = arith.constant 0 : index
    %c0_2 = arith.constant 0 : index
    %4 = vector.load %arg2[%c0_1, %c0_2] : memref<1x48xf32, #tpu.memory_space<vmem>>, vector<1x48xf32>
    %cst = arith.constant 0.000000e+00 : f32
    %5 = vector.shape_cast %4 : vector<1x48xf32> to vector<1x48xf32>
    %6 = vector.broadcast %5 : vector<1x48xf32> to vector<16x48xf32>
    %7 = vector.broadcast %cst : f32 to vector<16x48xf32>
    %8 = arith.select %3, %6, %7 : vector<16x48xi1>, vector<16x48xf32>
    %c0_3 = arith.constant 0 : index
    %c0_4 = arith.constant 0 : index
    %9 = vector.load %arg0[%c0_3, %c0_4] : memref<1x48xi32, #tpu.memory_space<vmem>>, vector<1x48xi32>
    %10 = vector.broadcast %9 : vector<1x48xi32> to vector<16x48xi32>
    %11 = arith.cmpi eq, %10, %0 : vector<16x48xi32>
    %12 = arith.extui %11 : vector<16x48xi1> to vector<16x48xi32>
    %13 = arith.sitofp %12 : vector<16x48xi32> to vector<16x48xf32>
    %cst_5 = arith.constant dense<0.000000e+00> : vector<16x16xf32>
    %14 = tpu.matmul %8, %13, %cst_5 {dimension_numbers = #tpu.dot_dimension_numbers<[1], [1], [0], [0], [0, 0, 1, 0], [], []>} : vector<16x48xf32>, vector<16x48xf32>, vector<16x16xf32> -> vector<16x16xf32>
    %c0_6 = arith.constant 0 : index
    %c0_7 = arith.constant 0 : index
    %15 = vector.load %arg3[%c0_6, %c0_7] : memref<16x64xf32, #tpu.memory_space<vmem>>, vector<16x64xf32>
    %cst_8 = arith.constant dense<0.000000e+00> : vector<16x64xf32>
    %16 = tpu.matmul %14, %15, %cst_8 {dimension_numbers = #tpu.dot_dimension_numbers<[1], [0], [0], [1], [0, 0, 1, 1], [], []>} : vector<16x16xf32>, vector<16x64xf32>, vector<16x64xf32> -> vector<16x64xf32>
    %c0_9 = arith.constant 0 : index
    %c0_10 = arith.constant 0 : index
    %17 = vector.load %arg4[%c0_9, %c0_10] : memref<64x64xf32, #tpu.memory_space<vmem>>, vector<64x64xf32>
    %cst_11 = arith.constant dense<0.000000e+00> : vector<16x64xf32>
    %18 = tpu.matmul %16, %17, %cst_11 {dimension_numbers = #tpu.dot_dimension_numbers<[1], [0], [0], [1], [0, 0, 1, 1], [], []>} : vector<16x64xf32>, vector<64x64xf32>, vector<16x64xf32> -> vector<16x64xf32>
    %c0_12 = arith.constant 0 : index
    %c0_13 = arith.constant 0 : index
    %19 = vector.load %arg5[%c0_12, %c0_13] : memref<64x64xf32, #tpu.memory_space<vmem>>, vector<64x64xf32>
    %cst_14 = arith.constant dense<0.000000e+00> : vector<16x64xf32>
    %20 = tpu.matmul %15, %19, %cst_14 {dimension_numbers = #tpu.dot_dimension_numbers<[1], [0], [0], [1], [0, 0, 1, 1], [], []>} : vector<16x64xf32>, vector<64x64xf32>, vector<16x64xf32> -> vector<16x64xf32>
    %21 = arith.addf %18, %20 : vector<16x64xf32>
    %c0_15 = arith.constant 0 : index
    %c0_16 = arith.constant 0 : index
    %22 = vector.load %arg6[%c0_15, %c0_16] : memref<1x64xf32, #tpu.memory_space<vmem>>, vector<1x64xf32>
    %23 = vector.broadcast %22 : vector<1x64xf32> to vector<16x64xf32>
    %24 = arith.addf %21, %23 : vector<16x64xf32>
    %cst_17 = arith.constant 0.000000e+00 : f32
    %25 = vector.broadcast %cst_17 : f32 to vector<16x64xf32>
    %26 = arith.maximumf %24, %25 : vector<16x64xf32>
    %cst_18 = arith.constant dense<0.000000e+00> : vector<16x64xf32>
    %27 = tpu.matmul %14, %26, %cst_18 {dimension_numbers = #tpu.dot_dimension_numbers<[1], [0], [0], [1], [0, 0, 1, 1], [], []>} : vector<16x16xf32>, vector<16x64xf32>, vector<16x64xf32> -> vector<16x64xf32>
    %c0_19 = arith.constant 0 : index
    %c0_20 = arith.constant 0 : index
    %28 = vector.load %arg7[%c0_19, %c0_20] : memref<64x128xf32, #tpu.memory_space<vmem>>, vector<64x128xf32>
    %cst_21 = arith.constant dense<0.000000e+00> : vector<16x128xf32>
    %29 = tpu.matmul %27, %28, %cst_21 {dimension_numbers = #tpu.dot_dimension_numbers<[1], [0], [0], [1], [0, 0, 1, 1], [], []>} : vector<16x64xf32>, vector<64x128xf32>, vector<16x128xf32> -> vector<16x128xf32>
    %c0_22 = arith.constant 0 : index
    %c0_23 = arith.constant 0 : index
    %30 = vector.load %arg8[%c0_22, %c0_23] : memref<64x128xf32, #tpu.memory_space<vmem>>, vector<64x128xf32>
    %cst_24 = arith.constant dense<0.000000e+00> : vector<16x128xf32>
    %31 = tpu.matmul %26, %30, %cst_24 {dimension_numbers = #tpu.dot_dimension_numbers<[1], [0], [0], [1], [0, 0, 1, 1], [], []>} : vector<16x64xf32>, vector<64x128xf32>, vector<16x128xf32> -> vector<16x128xf32>
    %32 = arith.addf %29, %31 : vector<16x128xf32>
    %c0_25 = arith.constant 0 : index
    %c0_26 = arith.constant 0 : index
    %33 = vector.load %arg9[%c0_25, %c0_26] : memref<1x128xf32, #tpu.memory_space<vmem>>, vector<1x128xf32>
    %34 = vector.broadcast %33 : vector<1x128xf32> to vector<16x128xf32>
    %35 = arith.addf %32, %34 : vector<16x128xf32>
    %cst_27 = arith.constant 0.000000e+00 : f32
    %36 = vector.broadcast %cst_27 : f32 to vector<16x128xf32>
    %37 = arith.maximumf %35, %36 : vector<16x128xf32>
    %c0_28 = arith.constant 0 : index
    %c0_29 = arith.constant 0 : index
    %38 = vector.load %arg10[%c0_28, %c0_29] : memref<16x128xf32, #tpu.memory_space<vmem>>, vector<16x128xf32>
    tpu.vector_store %arg10[%c0_28, %c0_29], %37 {strides = array<i32>} : memref<16x128xf32, #tpu.memory_space<vmem>>, vector<16x128xf32>,
    return
  }
}

</mosaic_0001>

<bundles_post_ra>
// kernel: net_forward.1
= control target key start
LH: loop header
LB: loop body
LE: loop exit
PB: predicated region body
PF: predicated region fallthrough
CT: control target
= control target key end

     0   :  { %15 = vsyncpa [#allocation3], 0  ;;  %s1160_s0 = inlined_call_operand.vmem [shape: s32[1,48], index: 0, kind: input, shape index: {}]   ;;  %s1161_s1 = inlined_call_operand.vmem [shape: s32[1,48], index: 1, kind: input, shape index: {}]   ;;  %s1162_s2 = inlined_call_operand.vmem [shape: f32[1,48], index: 2, kind: input, shape index: {}]   ;;  %s1163_s3 = inlined_call_operand.vmem [shape: f32[16,64], index: 3, kind: input, shape index: {}]   ;;  %s1164_s4 = inlined_call_operand.hbm [shape: f32[64,64], index: 4, kind: input, shape index: {}]   ;;  %s1165_s5 = inlined_call_operand.hbm [shape: f32[64,64], index: 5, kind: input, shape index: {}]   ;;  %s1166_s6 = inlined_call_operand.vmem [shape: f32[1,64], index: 6, kind: input, shape index: {}]   ;;  %s1167_s7 = inlined_call_operand.hbm [shape: f32[64,128], index: 7, kind: input, shape index: {}]   ;;  %s1168_s8 = inlined_call_operand.hbm [shape: f32[64,128], index: 8, kind: input, shape index: {}]   ;;  %s1169_s9 = inlined_call_operand.vmem [shape: f32[1,128], index: 9, kind: input, shape index: {}]   ;;  %s1170_s10 = inlined_call_operand.vmem [shape: f32[16,128], index: 10, kind: output, shape index: {}]  }
   0x1   :  { %16 = vsyncpa [#allocation5], 0 }
   0x2   :  { %17 = vsyncpa [#allocation8], 0  ;;  %s1020_s13 = smov [#allocation4]   ;;  %s1021_s15 = smov [#allocation2]  }
   0x3   :  { %s43_s14 = sshll.u32 %s1020_s13, 4  ;;  %s31_s16 = sshll.u32 %s1021_s15, 4  ;;  %s44_s14 = int_to_ptr.vmem [resolvable:$true] %s43_s14  ;;  %s32_s16 = int_to_ptr.vmem [resolvable:$true] %s31_s16 }
   0x4   :  { %s942_s17 = scalar_lea.vmem %s44_s14, 1024  ;;  %p947_p1 = scmp.lt.s32.totalorder %s44_s14, %s44_s14 }
   0x5   :  { %p943_p0 = scmp.ne.s32.totalorder %s44_s14, %s942_s17  ;;  %p948_p2 = scmp.lt.s32.totalorder %s942_s17, %s942_s17 }
   0x7   :  { %p949_p3 = por %p948_p2, %p947_p1 }
   0x9   :  { %p950_p4 = pnand %p949_p3, %p943_p0 }
   0xb   :  { %953 = shalt.err (!%p950_p4)
}
   0xc   :  { %s1022_s18 = smov 128   ;;  %s1023_s19 = smov 8  }
   0xd   :  { %49 = dma.hbm_to_vmem [thread:$0]  %s1165_s5, 1024, %s44_s14, [#allocation5], %s1022_s18, %s1022_s18, %s1023_s19  }
   0xe   :  { %s962_s22 = scalar_lea.vmem %s32_s16, 1024  ;;  %p967_p6 = scmp.lt.s32.totalorder %s32_s16, %s32_s16 }
   0xf   :  { %p963_p5 = scmp.ne.s32.totalorder %s32_s16, %s962_s22  ;;  %p968_p7 = scmp.lt.s32.totalorder %s962_s22, %s962_s22 }
  0x11   :  { %p969_p8 = por %p968_p7, %p967_p6 }
  0x13   :  { %p970_p9 = pnand %p969_p8, %p963_p5 }
  0x15   :  { %973 = shalt.err (!%p970_p9)
}
  0x16   :  { %37 = dma.hbm_to_vmem [thread:$0]  %s1164_s4, 1024, %s32_s16, [#allocation3], %s1022_s18, %s1022_s18, %s1023_s19  }
  0x17   :  { %s1024_s25 = smov [#allocation6]   ;;  %s1025_s27 = smov [#allocation7]  }
  0x18   :  { %s57_s26 = sshll.u32 %s1024_s25, 4  ;;  %s69_s28 = sshll.u32 %s1025_s27, 4  ;;  %s58_s26 = int_to_ptr.vmem [resolvable:$true] %s57_s26  ;;  %s70_s28 = int_to_ptr.vmem [resolvable:$true] %s69_s28 }
  0x19   :  { %s982_s5 = scalar_lea.vmem %s58_s26, 1024  ;;  %p987_p11 = scmp.lt.s32.totalorder %s58_s26, %s58_s26 }
  0x1a   :  { %p983_p10 = scmp.ne.s32.totalorder %s58_s26, %s982_s5  ;;  %p988_p12 = scmp.lt.s32.totalorder %s982_s5, %s982_s5 }
  0x1c   :  { %p989_p13 = por %p988_p12, %p987_p11 }
  0x1e   :  { %p990_p0 = pnand %p989_p13, %p983_p10 }
  0x20   :  { %993 = shalt.err (!%p990_p0)
}
  0x21   :  { %63 = dma.hbm_to_vmem [thread:$0]  %s1167_s7, 1024, %s58_s26, [#allocation5], %s1022_s18, %s1022_s18, %s1023_s19  }
  0x22   :  { %s1002_s4 = scalar_lea.vmem %s70_s28, 1024  ;;  %p1007_p2 = scmp.lt.s32.totalorder %s70_s28, %s70_s28 }
  0x23   :  { %p1003_p1 = scmp.ne.s32.totalorder %s70_s28, %s1002_s4  ;;  %p1008_p3 = scmp.lt.s32.totalorder %s1002_s4, %s1002_s4 }
  0x25   :  { %p1009_p4 = por %p1008_p3, %p1007_p2 }
  0x27   :  { %p1010_p5 = pnand %p1009_p4, %p1003_p1 }
  0x29   :  { %1013 = shalt.err (!%p1010_p5)
}
  0x2a   :  { %75 = dma.hbm_to_vmem [thread:$0]  %s1168_s8, 1024, %s70_s28, [#allocation8], %s1022_s18, %s1022_s18, %s1023_s19  }
  0x2b   :  { %1014 = dma.done.wait [#allocation3], 1024  }
  0x2c   :  { %1015 = vsyncadd [#allocation3], 4294966272 }
  0x2d   :  { %1016 = dma.done.wait [#allocation5], 2048  }
  0x2e   :  { %1017 = vsyncadd [#allocation5], 4294965248 }
  0x2f   :  { %1018 = dma.done.wait [#allocation8], 1024  }
  0x30   :  { %1019 = vsyncadd [#allocation8], 4294966272  ;;  %v90_v0 = vlaneseq  ;;  %vm120_vm0 = vcmask 392192   ;;  %v757_v3 = vld [vmem:[%s1160_s0] ss:$0 sm:$0xff]  ;;  %v1118_v6 = vld [vmem:[%s1163_s3 + $0x8] sm:$0xff] }
  0x31   :  { %v755_v4 = vld [vmem:[%s1161_s1] ss:$0 sm:$0xff]  ;;  %v1026_v7 = vmov 0.0   ;;  %837 = vmatprep.subr.mxu1 %v1118_v6  ;;  %v307_v13 = vld [vmem:[#allocation4 + $0x38] sm:$0xff]  ;;  %v298_v15 = vld [vmem:[#allocation2 + $0x30] sm:$0xff]  ;;  %vm210_vm5 = vcmask 130048  }
  0x32   :  { %v91_v1 = vshrl.u32 %v90_v0, 7  ;;  %v756_v5 = vld [vmem:[%s1162_s2] ss:$0 sm:$0xff]  ;;  %838 = vmatpush3.msra.mxu1 %v1118_v6  ;;  %v299_v14 = vld [vmem:[#allocation2 + $0x38] sm:$0xff]  ;;  %v297_v16 = vld [vmem:[#allocation2 + $0x28] sm:$0xff]  ;;  %vm308_vm6 = vcmask 523264  }
  0x33   :  { %v208_v12 = vld [vmem:[%s1163_s3] sm:$0xff]  ;;  %v295_v18 = vld [vmem:[#allocation2 + $0x18] sm:$0xff]  ;;  %v294_v19 = vld [vmem:[#allocation2 + $0x10] sm:$0xff] }
  0x34   :  { %v92_v2 = vadd.s32 8, %v91_v1  ;;  %vm114_vm1 = vcmp.eq.s32.totalorder %v757_v3, %v91_v1  ;;  %vm98_vm3 = vcmp.eq.s32.totalorder %v755_v4, %v91_v1  ;;  %839 = vmatprep.subr.mxu1 %v208_v12  ;;  %v296_v17 = vld [vmem:[#allocation2 + $0x20] sm:$0xff]  ;;  %v306_v22 = vld [vmem:[#allocation4 + $0x30] sm:$0xff]  ;;  %v305_v23 = vld [vmem:[#allocation4 + $0x28] sm:$0xff] }
  0x35   :  { %v758_v8 = vsel %vm114_vm1, 1.0, %v1026_v7  ;;  %v107_v10 = vsel %vm98_vm3, %v756_v5, 0.0  ;;  %840 = vmatpush3.msra.mxu1 %v208_v12  ;;  %v304_v24 = vld [vmem:[#allocation4 + $0x20] sm:$0xff]  ;;  %v303_v25 = vld [vmem:[#allocation4 + $0x18] sm:$0xff]  ;;  %v302_v26 = vld [vmem:[#allocation4 + $0x10] sm:$0xff] }
  0x36   :  { %vm115_vm2 = vcmp.eq.s32.totalorder %v757_v3, %v92_v2  ;;  %834 = vmatprep.mubr.msk.f32.mxu0 %vm120_vm0, %v107_v10  ;;  %vm99_vm4 = vcmp.eq.s32.totalorder %v755_v4, %v92_v2  ;;  %844 = vmatprep.subr.mxu1 %v307_v13  ;;  %v301_v27 = vld [vmem:[#allocation4 + $0x8] sm:$0xff]  ;;  %v300_v28 = vld [vmem:[#allocation4] sm:$0xff]  ;;  %v572_v31 = vld [vmem:[#allocation7 + $0x38] sm:$0xff] }
  0x37   :  { %v759_v9 = vsel %vm115_vm2, 1.0, %v1026_v7  ;;  %v108_v11 = vsel %vm99_vm4, %v756_v5, 0.0  ;;  %v293_v29 = vld [vmem:[#allocation2 + $0x8] sm:$0xff]  ;;  %v292_v30 = vld [vmem:[#allocation2] sm:$0xff]  ;;  %v571_v34 = vld [vmem:[#allocation7 + $0x30] sm:$0xff] }
  0x38   :  { %830 = vmatprep.subr.msk.mxu0 %vm120_vm0, %v759_v9  ;;  %v570_v35 = vld [vmem:[#allocation7 + $0x28] sm:$0xff]  ;;  %v569_v36 = vld [vmem:[#allocation7 + $0x20] sm:$0xff]  ;;  %v568_v37 = vld [vmem:[#allocation7 + $0x18] sm:$0xff] }
  0x39   :  { %831 = vmatpush3.xpose.msk.msra.mxu0 %vm120_vm0, %v759_v9  ;;  %v567_v38 = vld [vmem:[#allocation7 + $0x10] sm:$0xff]  ;;  %v566_v39 = vld [vmem:[#allocation7 + $0x8] sm:$0xff]  ;;  %v565_v40 = vld [vmem:[#allocation7] sm:$0xff] }
  0x3a   :  { %832 = vmatprep.subr.msk.mxu0 %vm120_vm0, %v758_v8  ;;  %v770_v43 = vld [vmem:[%s1166_s6] ss:$0 sm:$0xff]  ;;  %v564_v52 = vld [vmem:[#allocation6 + $0x38] sm:$0xff]  ;;  %v563_v53 = vld [vmem:[#allocation6 + $0x30] sm:$0xff] }
  0x3b   :  { %v562_v54 = vld [vmem:[#allocation6 + $0x28] sm:$0xff]  ;;  %v561_v55 = vld [vmem:[#allocation6 + $0x20] sm:$0xff]  ;;  %v560_v56 = vld [vmem:[#allocation6 + $0x18] sm:$0xff] }
  0x3c   :  { %v559_v57 = vld [vmem:[#allocation6 + $0x10] sm:$0xff]  ;;  %v558_v58 = vld [vmem:[#allocation6 + $0x8] sm:$0xff]  ;;  %v557_v59 = vld [vmem:[#allocation6] sm:$0xff] }
  0x3d   :  { %833 = vmatpush3.xpose.msk.msra.mxu0 %vm120_vm0, %v758_v8  ;;  %v777_v0 = vld [vmem:[%s1169_s9] ss:$0 sm:$0xff] }
  0x3e   :  { %863 = vmatprep.subr.mxu0 %v299_v14 }
  0x40   :  { %835 = vmatmul.mubr.msk.f32.vlgmr.msra.gmra.mxu0 %vm120_vm0, %v108_v11 }
  0x41   :  { %864 = vmatpush3.msra.mxu0 %v299_v14 }
  0x42   :  { %865 = vmatprep.subr.mxu0 %v298_v15 }
  0x43   :  { %866 = vmatpush3.msra.mxu0 %v298_v15 }
  0x44   :  { %867 = vmatprep.subr.mxu0 %v297_v16 }
  0x45   :  { %868 = vmatpush3.msra.mxu0 %v297_v16 }
  0x46   :  { %869 = vmatprep.subr.mxu0 %v296_v17 }
  0x47   :  { %870 = vmatpush3.msra.mxu0 %v296_v17 }
  0x48   :  { %871 = vmatprep.subr.mxu0 %v295_v18 }
  0x49   :  { %872 = vmatpush3.msra.mxu0 %v295_v18 }
  0x4a   :  { %873 = vmatprep.subr.mxu0 %v294_v19 }
  0x4b   :  { %874 = vmatpush3.msra.mxu0 %v294_v19 }
  0x4c   :  { %875 = vmatprep.subr.mxu0 %v293_v29 }
  0x4d   :  { %876 = vmatpush3.msra.mxu0 %v293_v29 }
  0x4e   :  { %877 = vmatprep.subr.mxu0 %v292_v30 }
  0x4f   :  { %878 = vmatpush3.msra.mxu0 %v292_v30 }
  0x50   :  { %889 = vmatprep.subr.mxu0 %v572_v31 }
 0x100   :  { %v1131_v20 = vpop.f32.mrf.mxu0 }
 0x102   :  { %v199_v21 = vpop.f32.mrf.mxu0 }
 0x103   :  { %841 = vmatprep.mubr.msk.f32.mxu1 %vm210_vm5, %v199_v21 }
 0x104   :  { %842 = vmatmul.mubr.msk.f32.vlgmr.msra.gmra.mxu1 %vm210_vm5, %v1131_v20 }
 0x105   :  { %845 = vmatpush3.msra.mxu1 %v307_v13  ;;  %860 = vmatprep.mubr.msk.f32.mxu1 %vm308_vm6, %v208_v12 }
 0x106   :  { %846 = vmatprep.subr.mxu1 %v306_v22 }
 0x107   :  { %847 = vmatpush3.msra.mxu1 %v306_v22 }
 0x108   :  { %848 = vmatprep.subr.mxu1 %v305_v23 }
 0x109   :  { %849 = vmatpush3.msra.mxu1 %v305_v23 }
 0x10a   :  { %850 = vmatprep.subr.mxu1 %v304_v24 }
 0x10b   :  { %851 = vmatpush3.msra.mxu1 %v304_v24 }
 0x10c   :  { %852 = vmatprep.subr.mxu1 %v303_v25 }
 0x10d   :  { %853 = vmatpush3.msra.mxu1 %v303_v25 }
 0x10e   :  { %854 = vmatprep.subr.mxu1 %v302_v26 }
 0x10f   :  { %855 = vmatpush3.msra.mxu1 %v302_v26 }
 0x110   :  { %856 = vmatprep.subr.mxu1 %v301_v27 }
 0x111   :  { %857 = vmatpush3.msra.mxu1 %v301_v27 }
 0x112   :  { %858 = vmatprep.subr.mxu1 %v300_v28 }
 0x113   :  { %859 = vmatpush3.msra.mxu1 %v300_v28 }
 0x114   :  { %861 = vmatmul.mubr.msk.f32.vlgmr.msra.gmra.mxu1 %vm308_vm6, %v1118_v6 }
 0x115   :  { %886 = vmatprep.mubr.msk.f32.mxu1 %vm210_vm5, %v199_v21 }
 0x1c4   :  { %v843_v32 = vpop.f32.mrf.mxu1 }
 0x1c6   :  { %v283_v33 = vpop.f32.mrf.mxu1 }
 0x1c7   :  { %879 = vmatprep.mubr.msk.f32.mxu0 %vm308_vm6, %v283_v33 }
 0x1c8   :  { %880 = vmatmul.mubr.msk.f32.vlgmr.msra.gmra.mxu0 %vm308_vm6, %v843_v32 }
 0x1c9   :  { %890 = vmatpush3.msra.mxu0 %v572_v31 }
 0x1ca   :  { %891 = vmatprep.subr.mxu0 %v571_v34 }
 0x1cb   :  { %892 = vmatpush3.msra.mxu0 %v571_v34 }
 0x1cc   :  { %893 = vmatprep.subr.mxu0 %v570_v35 }
 0x1cd   :  { %894 = vmatpush3.msra.mxu0 %v570_v35 }
 0x1ce   :  { %895 = vmatprep.subr.mxu0 %v569_v36 }
 0x1cf   :  { %896 = vmatpush3.msra.mxu0 %v569_v36 }
 0x1d0   :  { %897 = vmatprep.subr.mxu0 %v568_v37 }
 0x1d1   :  { %898 = vmatpush3.msra.mxu0 %v568_v37 }
 0x1d2   :  { %899 = vmatprep.subr.mxu0 %v567_v38 }
 0x1d3   :  { %900 = vmatpush3.msra.mxu0 %v567_v38 }
 0x1d4   :  { %901 = vmatprep.subr.mxu0 %v566_v39  ;;  %v862_v41 = vpop.f32.mrf.mxu1 }
 0x1d5   :  { %902 = vmatpush3.msra.mxu0 %v566_v39 }
 0x1d6   :  { %903 = vmatprep.subr.mxu0 %v565_v40  ;;  %v381_v45 = vpop.f32.mrf.mxu1 }
 0x1d7   :  { %904 = vmatpush3.msra.mxu0 %v565_v40 }
 0x288   :  { %v881_v42 = vpop.f32.mrf.mxu0 }
 0x289   :  { %v468_v44 = vadd.f32 %v881_v42, %v862_v41 }
 0x28a   :  { %v462_v46 = vpop.f32.mrf.mxu0 }
 0x28b   :  { %v479_v47 = vadd.f32 %v770_v43, %v468_v44  ;;  %v463_v48 = vadd.f32 %v462_v46, %v381_v45 }
 0x28d   :  { %v481_v49 = vmax.f32 %v479_v47, 0.0  ;;  %v478_v50 = vadd.f32 %v770_v43, %v463_v48 }
 0x28f   :  { %v480_v51 = vmax.f32 %v478_v50, 0.0  ;;  %882 = vmatprep.subr.mxu1 %v481_v49 }
 0x290   :  { %883 = vmatpush3.msra.mxu1 %v481_v49 }
 0x291   :  { %884 = vmatprep.subr.mxu1 %v480_v51  ;;  %905 = vmatprep.mubr.msk.f32.mxu0 %vm308_vm6, %v480_v51 }
 0x292   :  { %885 = vmatpush3.msra.mxu1 %v480_v51  ;;  %906 = vmatmul.mubr.msk.f32.vlgmr.msra.gmra.mxu0 %vm308_vm6, %v481_v49 }
 0x293   :  { %887 = vmatmul.mubr.msk.f32.vlgmr.msra.gmra.mxu1 %vm210_vm5, %v1131_v20  ;;  %908 = vmatprep.subr.mxu1 %v564_v52 }
 0x294   :  { %909 = vmatpush3.msra.mxu1 %v564_v52 }
 0x295   :  { %910 = vmatprep.subr.mxu1 %v563_v53 }
 0x296   :  { %911 = vmatpush3.msra.mxu1 %v563_v53 }
 0x297   :  { %912 = vmatprep.subr.mxu1 %v562_v54 }
 0x298   :  { %913 = vmatpush3.msra.mxu1 %v562_v54 }
 0x299   :  { %914 = vmatprep.subr.mxu1 %v561_v55 }
 0x29a   :  { %915 = vmatpush3.msra.mxu1 %v561_v55 }
 0x29b   :  { %916 = vmatprep.subr.mxu1 %v560_v56 }
 0x29c   :  { %917 = vmatpush3.msra.mxu1 %v560_v56 }
 0x29d   :  { %918 = vmatprep.subr.mxu1 %v559_v57 }
 0x29e   :  { %919 = vmatpush3.msra.mxu1 %v559_v57 }
 0x29f   :  { %920 = vmatprep.subr.mxu1 %v558_v58 }
 0x2a0   :  { %921 = vmatpush3.msra.mxu1 %v558_v58 }
 0x2a1   :  { %922 = vmatprep.subr.mxu1 %v557_v59 }
 0x2a2   :  { %923 = vmatpush3.msra.mxu1 %v557_v59 }
 0x352   :  { %v907_v62 = vpop.f32.mrf.mxu0 }
 0x353   :  { %v888_v60 = vpop.f32.mrf.mxu1 }
 0x354   :  { %v645_v2 = vpop.f32.mrf.mxu0 }
 0x355   :  { %v548_v61 = vpop.f32.mrf.mxu1 }
 0x356   :  { %924 = vmatprep.mubr.msk.f32.mxu1 %vm308_vm6, %v548_v61 }
 0x357   :  { %925 = vmatmul.mubr.msk.f32.vlgmr.msra.gmra.mxu1 %vm308_vm6, %v888_v60 }
 0x417   :  { %v926_v63 = vpop.f32.mrf.mxu1 }
 0x418   :  { %v732_v1 = vadd.f32 %v926_v63, %v907_v62 }
 0x419   :  { %v726_v3 = vpop.f32.mrf.mxu1 }
 0x41a   :  { %v743_v4 = vadd.f32 %v777_v0, %v732_v1  ;;  %v727_v5 = vadd.f32 %v726_v3, %v645_v2 }
 0x41c   :  { %v745_v6 = vmax.f32 %v743_v4, 0.0  ;;  %v742_v7 = vadd.f32 %v777_v0, %v727_v5 }
 0x41e   :  { %747 = vst [vmem:[%s1170_s10 + $0x8] sm:$0xff] %v745_v6  ;;  %v744_v8 = vmax.f32 %v742_v7, 0.0 }
 0x420   :  { %746 = vst [vmem:[%s1170_s10] sm:$0xff] %v744_v8 }
 0x421   :  { %752 = vsyncpa [#allocation3], 1 }
 0x422   :  { %753 = vsyncpa [#allocation5], 1 }
 0x423   :  { %754 = vsyncpa [#allocation8], 1 }

</bundles_post_ra>
